<compile_context>
chip_gen: v5e
topology: v5e:2x2
jax: 0.10.0
libtpu: 0.0.40
codegen_flags: <defaults>
</compile_context>

<pallas_src>
import jax
import jax.numpy as jnp
from jax.experimental import pallas as pl
from jax.experimental.pallas import tpu as pltpu


def _round_up(x, m):
    return ((x + m - 1) // m) * m


def _cdiv(a, b):
    return (a + b - 1) // b


def _attentive_pooling_kernel(x_ref, w_score_ref, w_conv_ref, shift_ref, o_ref):
    """One (batch, point-tile) grid step.

    x_ref       : (K, C_in, P)   input dtype (f32) — points on the lane axis
    w_score_ref : (C_in, C_in)   MXU dtype (bf16 by default), Linear (no bias)
    w_conv_ref  : (C_out, C_in)  MXU dtype, 1x1 conv weight with BN scale folded
    shift_ref   : (C_out, 1)     f32, conv bias + BN shift folded
    o_ref       : (C_out, P)     f32
    """
    K = x_ref.shape[0]
    mxu_dtype = w_score_ref.dtype
    w_s = w_score_ref[...]                                  # resident across all K matmuls

    # Score linear: K unrolled (C_in,C_in)@(C_in,P) MXU matmuls, f32 accumulation.
    s = [jnp.dot(w_s, x_ref[k].astype(mxu_dtype),
                 preferred_element_type=jnp.float32)        # (C_in, P) f32
         for k in range(K)]

    # Softmax over K: elementwise across the K slabs (pure VPU, no XLU reduce).
    m = s[0]
    for k in range(1, K):
        m = jnp.maximum(m, s[k])

    denom = None
    feats = None                                            # un-normalized sum_k e_k * x_k
    for k in range(K):
        e_k = jnp.exp(s[k] - m)                             # (C_in, P) f32
        x_k = x_ref[k].astype(jnp.float32)
        denom = e_k if denom is None else denom + e_k
        feats = e_k * x_k if feats is None else feats + e_k * x_k

    # Softmax denominator: EUP approx reciprocal + one Newton step (f32 accuracy),
    # applied on the reduced (C_in, P) shape so `scores` is never materialized.
    r = pl.reciprocal(denom, approx=True)
    r = r * (2.0 - denom * r)
    feats = feats * r                                       # (C_in, P)

    # 1x1 conv (BN scale folded into weight), then shift + ReLU.
    out = jnp.dot(w_conv_ref[...], feats.astype(mxu_dtype),
                  preferred_element_type=jnp.float32)       # (C_out, P)
    out = jnp.maximum(out + shift_ref[...], 0.0)
    o_ref[...] = out.astype(o_ref.dtype)


def _pick_tile(n, b, c_in, k, c_out, tile_p_max):
    """Lane-tile (multiple of 128) from a VMEM budget; >=2 grid steps if possible."""
    n_128 = _round_up(max(n, 1), 128)
    # Conservative per-point-column bytes: double-buffered f32 input
    # + ~3 live (K, C_in) f32 temps + double-buffered f32 output.
    budget = 12 * 1024 * 1024     # fits v5e's 16 MiB scoped default; << v7x 64 MiB VMEM
    per_point = 2 * k * c_in * 4 + 3 * k * c_in * 4 + 2 * c_out * 4
    tile = max(128, (budget // per_point) // 128 * 128)
    tile = min(tile, tile_p_max, n_128)
    # Guarantee at least 2 grid steps so both v7x TensorCores get work.
    if b * _cdiv(n_128, tile) < 2:
        tile = min(n_128, max(128, _round_up(_cdiv(n, 2), 128)))
    return tile


def attentive_pooling_pallas_kcn(x_kcn, params, *, tile_p_max=4096,
                                 mxu_dtype=jnp.bfloat16):
    """Preferred entry point.  x_kcn: (B, K, C_in, N) -> (B, C_out, N) float32."""
    B, K, C_in, N = x_kcn.shape
    w_score = params["w_score"]                 # (C_in, C_in)
    w_conv = params["w_conv"]                   # (C_out, C_in)
    b_conv = params["b_conv"]                   # (C_out,)
    gamma, beta = params["bn_gamma"], params["bn_beta"]
    rmean, rvar, eps = params["bn_mean"], params["bn_var"], params["bn_eps"]
    C_out = w_conv.shape[0]

    # Fold eval-mode BN + conv bias into one weight and one per-channel shift.
    bn_scale = gamma / jnp.sqrt(rvar + eps)                              # (C_out,)
    w_conv_eff = (bn_scale[:, None] * w_conv).astype(mxu_dtype)          # (C_out, C_in)
    shift = (bn_scale * (b_conv - rmean) + beta).reshape(C_out, 1).astype(jnp.float32)
    w_score_eff = w_score.astype(mxu_dtype)                              # (C_in, C_in)

    tile = _pick_tile(N, B, C_in, K, C_out, tile_p_max)
    n_pad = _round_up(N, tile)
    if n_pad != N:
        x_kcn = jnp.pad(x_kcn, ((0, 0), (0, 0), (0, 0), (0, n_pad - N)))

    grid = (B, n_pad // tile)

    out = pl.pallas_call(
        _attentive_pooling_kernel,
        out_shape=jax.ShapeDtypeStruct((B, C_out, n_pad), jnp.float32),
        grid=grid,
        in_specs=[
            # Batch dim squeezed out of the kernel ref -> (K, C_in, tile).
            pl.BlockSpec((None, K, C_in, tile), lambda b, j: (b, 0, 0, j)),
            pl.BlockSpec((C_in, C_in), lambda b, j: (0, 0)),
            pl.BlockSpec((C_out, C_in), lambda b, j: (0, 0)),
            pl.BlockSpec((C_out, 1), lambda b, j: (0, 0)),
        ],
        out_specs=pl.BlockSpec((None, C_out, tile), lambda b, j: (b, 0, j)),
        compiler_params=pltpu.CompilerParams(
            dimension_semantics=("parallel", "parallel")),
    )(x_kcn, w_score_eff, w_conv_eff, shift)

    return out[:, :, :N]


def attentive_pooling_pallas(x_nchw, params, *, tile_p_max=4096,
                             mxu_dtype=jnp.bfloat16):
    """PyTorch-layout wrapper.  x_nchw: (B, C_in, N, K) -> (B, C_out, N, 1)."""
    # TODO(synk): extra HBM relayout pass; prefer attentive_pooling_pallas_kcn
    # with the (B, K, C_in, N) layout produced upstream.
    x_kcn = jnp.transpose(x_nchw, (0, 3, 1, 2))              # (B, K, C_in, N)
    out = attentive_pooling_pallas_kcn(x_kcn, params, tile_p_max=tile_p_max,
                                       mxu_dtype=mxu_dtype)
    return out[..., None]                                    # (B, C_out, N, 1)


def attentive_pooling_reference(x_nchw, params):
    """Pure-JAX reference mirroring the PyTorch forward (eval-mode BN)."""
    w_score = params["w_score"]
    w_conv = params["w_conv"]
    b_conv = params["b_conv"]
    gamma, beta = params["bn_gamma"], params["bn_beta"]
    rmean, rvar, eps = params["bn_mean"], params["bn_var"], params["bn_eps"]

    xp = jnp.transpose(x_nchw, (0, 2, 3, 1))                  # (B, N, K, C)
    s = jnp.einsum("bnkc,dc->bnkd", xp, w_score)              # Linear, no bias
    p = jax.nn.softmax(s, axis=2)                             # softmax over K
    scores = jnp.transpose(p, (0, 3, 1, 2))                   # (B, C, N, K)
    feats = jnp.sum(scores * x_nchw, axis=-1, keepdims=True)  # (B, C, N, 1)
    out = jnp.einsum("bcnk,dc->bdnk", feats, w_conv) + b_conv[None, :, None, None]
    out = (out - rmean[None, :, None, None]) / jnp.sqrt(rvar[None, :, None, None] + eps)
    out = out * gamma[None, :, None, None] + beta[None, :, None, None]
    return jnp.maximum(out, 0.0)


def make_params(key, c_in, c_out):
    k1, k2, k3, k4, k5, k6, k7 = jax.random.split(key, 7)
    return {
        "w_score": jax.random.normal(k1, (c_in, c_in), jnp.float32) * 0.2,
        "w_conv": jax.random.normal(k2, (c_out, c_in), jnp.float32) * 0.2,
        "b_conv": jax.random.normal(k3, (c_out,), jnp.float32) * 0.1,
        "bn_gamma": 1.0 + 0.1 * jax.random.normal(k4, (c_out,), jnp.float32),
        "bn_beta": 0.1 * jax.random.normal(k5, (c_out,), jnp.float32),
        "bn_mean": 0.1 * jax.random.normal(k6, (c_out,), jnp.float32),
        "bn_var": 1.0 + 0.1 * jnp.abs(jax.random.normal(k7, (c_out,), jnp.float32)),
        "bn_eps": 1e-6,
    }


if __name__ == "__main__":
    key = jax.random.PRNGKey(0)
    kx, kp = jax.random.split(key)

    B, C_IN, N, K = 2, 8, 16, 8     # x: (B, d_in, N, K) — PyTorch NCHW
    C_OUT = 16

    x = jax.random.normal(kx, (B, C_IN, N, K), jnp.float32)
    params = make_params(kp, C_IN, C_OUT)
    ref = attentive_pooling_reference(x, params)

    # Perf-mode path: bf16 MXU operands, f32 accumulation / softmax math.
    out_bf16 = jax.block_until_ready(attentive_pooling_pallas(x, params))
    assert out_bf16.shape == (B, C_OUT, N, 1), out_bf16.shape
    assert jnp.allclose(out_bf16, ref, atol=5e-2, rtol=5e-2), (
        float(jnp.max(jnp.abs(out_bf16 - ref))))

    # Full-f32 MXU path for a tight numerical check of the kernel math.
    out_f32 = jax.block_until_ready(
        attentive_pooling_pallas(x, params, mxu_dtype=jnp.float32))
    assert jnp.allclose(out_f32, ref, atol=1e-3, rtol=1e-3), (
        float(jnp.max(jnp.abs(out_f32 - ref))))

    print("KERNEL_OK")
</pallas_src>

<mosaic_0001>
module attributes {stable_mosaic.version = 11 : i64} {
  func.func @_attentive_pooling_kernel(%arg0: i32, %arg1: i32, %arg2: memref<1x8x8x128xf32, #tpu.memory_space<vmem>>, %arg3: memref<8x8xbf16, #tpu.memory_space<vmem>>, %arg4: memref<16x8xbf16, #tpu.memory_space<vmem>>, %arg5: memref<16x1xf32, #tpu.memory_space<vmem>>, %arg6: memref<1x16x128xf32, #tpu.memory_space<vmem>>) attributes {dimension_semantics = [#tpu.dimension_semantics<parallel>, #tpu.dimension_semantics<parallel>], iteration_bounds = array<i64: 2, 1>, scalar_prefetch = 0 : i64, scratch_operands = 0 : i64, tpu.core_type = #tpu.core_type<tc>, window_params = [{transform_indices = @transform_0, window_bounds = array<i64: 1, 8, 8, 128>}, {pipeline_mode = #tpu.pipeline_mode<synchronous>, transform_indices = @transform_1, window_bounds = array<i64: 8, 8>}, {pipeline_mode = #tpu.pipeline_mode<synchronous>, transform_indices = @transform_2, window_bounds = array<i64: 16, 8>}, {pipeline_mode = #tpu.pipeline_mode<synchronous>, transform_indices = @transform_3, window_bounds = array<i64: 16, 1>}, {transform_indices = @transform_4, window_bounds = array<i64: 1, 16, 128>}]} {
    %c0 = arith.constant 0 : index
    %c0_0 = arith.constant 0 : index
    %0 = vector.load %arg3[%c0, %c0_0] : memref<8x8xbf16, #tpu.memory_space<vmem>>, vector<8x8xbf16>
    %c0_1 = arith.constant 0 : index
    %c0_2 = arith.constant 0 : index
    %c0_3 = arith.constant 0 : index
    %c0_4 = arith.constant 0 : index
    %1 = vector.load %arg2[%c0_1, %c0_2, %c0_3, %c0_4] : memref<1x8x8x128xf32, #tpu.memory_space<vmem>>, vector<1x1x8x128xf32>
    %2 = vector.shape_cast %1 : vector<1x1x8x128xf32> to vector<8x128xf32>
    %3 = arith.truncf %2 : vector<8x128xf32> to vector<8x128xbf16>
    %cst = arith.constant dense<0.000000e+00> : vector<8x128xf32>
    %4 = tpu.matmul %0, %3, %cst {dimension_numbers = #tpu.dot_dimension_numbers<[1], [0], [0], [1], [0, 0, 1, 1], [], []>} : vector<8x8xbf16>, vector<8x128xbf16>, vector<8x128xf32> -> vector<8x128xf32>
    %c0_5 = arith.constant 0 : index
    %c1 = arith.constant 1 : index
    %c0_6 = arith.constant 0 : index
    %c0_7 = arith.constant 0 : index
    %5 = vector.load %arg2[%c0_5, %c1, %c0_6, %c0_7] : memref<1x8x8x128xf32, #tpu.memory_space<vmem>>, vector<1x1x8x128xf32>
    %6 = vector.shape_cast %5 : vector<1x1x8x128xf32> to vector<8x128xf32>
    %7 = arith.truncf %6 : vector<8x128xf32> to vector<8x128xbf16>
    %cst_8 = arith.constant dense<0.000000e+00> : vector<8x128xf32>
    %8 = tpu.matmul %0, %7, %cst_8 {dimension_numbers = #tpu.dot_dimension_numbers<[1], [0], [0], [1], [0, 0, 1, 1], [], []>} : vector<8x8xbf16>, vector<8x128xbf16>, vector<8x128xf32> -> vector<8x128xf32>
    %c0_9 = arith.constant 0 : index
    %c2 = arith.constant 2 : index
    %c0_10 = arith.constant 0 : index
    %c0_11 = arith.constant 0 : index
    %9 = vector.load %arg2[%c0_9, %c2, %c0_10, %c0_11] : memref<1x8x8x128xf32, #tpu.memory_space<vmem>>, vector<1x1x8x128xf32>
    %10 = vector.shape_cast %9 : vector<1x1x8x128xf32> to vector<8x128xf32>
    %11 = arith.truncf %10 : vector<8x128xf32> to vector<8x128xbf16>
    %cst_12 = arith.constant dense<0.000000e+00> : vector<8x128xf32>
    %12 = tpu.matmul %0, %11, %cst_12 {dimension_numbers = #tpu.dot_dimension_numbers<[1], [0], [0], [1], [0, 0, 1, 1], [], []>} : vector<8x8xbf16>, vector<8x128xbf16>, vector<8x128xf32> -> vector<8x128xf32>
    %c0_13 = arith.constant 0 : index
    %c3 = arith.constant 3 : index
    %c0_14 = arith.constant 0 : index
    %c0_15 = arith.constant 0 : index
    %13 = vector.load %arg2[%c0_13, %c3, %c0_14, %c0_15] : memref<1x8x8x128xf32, #tpu.memory_space<vmem>>, vector<1x1x8x128xf32>
    %14 = vector.shape_cast %13 : vector<1x1x8x128xf32> to vector<8x128xf32>
    %15 = arith.truncf %14 : vector<8x128xf32> to vector<8x128xbf16>
    %cst_16 = arith.constant dense<0.000000e+00> : vector<8x128xf32>
    %16 = tpu.matmul %0, %15, %cst_16 {dimension_numbers = #tpu.dot_dimension_numbers<[1], [0], [0], [1], [0, 0, 1, 1], [], []>} : vector<8x8xbf16>, vector<8x128xbf16>, vector<8x128xf32> -> vector<8x128xf32>
    %c0_17 = arith.constant 0 : index
    %c4 = arith.constant 4 : index
    %c0_18 = arith.constant 0 : index
    %c0_19 = arith.constant 0 : index
    %17 = vector.load %arg2[%c0_17, %c4, %c0_18, %c0_19] : memref<1x8x8x128xf32, #tpu.memory_space<vmem>>, vector<1x1x8x128xf32>
    %18 = vector.shape_cast %17 : vector<1x1x8x128xf32> to vector<8x128xf32>
    %19 = arith.truncf %18 : vector<8x128xf32> to vector<8x128xbf16>
    %cst_20 = arith.constant dense<0.000000e+00> : vector<8x128xf32>
    %20 = tpu.matmul %0, %19, %cst_20 {dimension_numbers = #tpu.dot_dimension_numbers<[1], [0], [0], [1], [0, 0, 1, 1], [], []>} : vector<8x8xbf16>, vector<8x128xbf16>, vector<8x128xf32> -> vector<8x128xf32>
    %c0_21 = arith.constant 0 : index
    %c5 = arith.constant 5 : index
    %c0_22 = arith.constant 0 : index
    %c0_23 = arith.constant 0 : index
    %21 = vector.load %arg2[%c0_21, %c5, %c0_22, %c0_23] : memref<1x8x8x128xf32, #tpu.memory_space<vmem>>, vector<1x1x8x128xf32>
    %22 = vector.shape_cast %21 : vector<1x1x8x128xf32> to vector<8x128xf32>
    %23 = arith.truncf %22 : vector<8x128xf32> to vector<8x128xbf16>
    %cst_24 = arith.constant dense<0.000000e+00> : vector<8x128xf32>
    %24 = tpu.matmul %0, %23, %cst_24 {dimension_numbers = #tpu.dot_dimension_numbers<[1], [0], [0], [1], [0, 0, 1, 1], [], []>} : vector<8x8xbf16>, vector<8x128xbf16>, vector<8x128xf32> -> vector<8x128xf32>
    %c0_25 = arith.constant 0 : index
    %c6 = arith.constant 6 : index
    %c0_26 = arith.constant 0 : index
    %c0_27 = arith.constant 0 : index
    %25 = vector.load %arg2[%c0_25, %c6, %c0_26, %c0_27] : memref<1x8x8x128xf32, #tpu.memory_space<vmem>>, vector<1x1x8x128xf32>
    %26 = vector.shape_cast %25 : vector<1x1x8x128xf32> to vector<8x128xf32>
    %27 = arith.truncf %26 : vector<8x128xf32> to vector<8x128xbf16>
    %cst_28 = arith.constant dense<0.000000e+00> : vector<8x128xf32>
    %28 = tpu.matmul %0, %27, %cst_28 {dimension_numbers = #tpu.dot_dimension_numbers<[1], [0], [0], [1], [0, 0, 1, 1], [], []>} : vector<8x8xbf16>, vector<8x128xbf16>, vector<8x128xf32> -> vector<8x128xf32>
    %c0_29 = arith.constant 0 : index
    %c7 = arith.constant 7 : index
    %c0_30 = arith.constant 0 : index
    %c0_31 = arith.constant 0 : index
    %29 = vector.load %arg2[%c0_29, %c7, %c0_30, %c0_31] : memref<1x8x8x128xf32, #tpu.memory_space<vmem>>, vector<1x1x8x128xf32>
    %30 = vector.shape_cast %29 : vector<1x1x8x128xf32> to vector<8x128xf32>
    %31 = arith.truncf %30 : vector<8x128xf32> to vector<8x128xbf16>
    %cst_32 = arith.constant dense<0.000000e+00> : vector<8x128xf32>
    %32 = tpu.matmul %0, %31, %cst_32 {dimension_numbers = #tpu.dot_dimension_numbers<[1], [0], [0], [1], [0, 0, 1, 1], [], []>} : vector<8x8xbf16>, vector<8x128xbf16>, vector<8x128xf32> -> vector<8x128xf32>
    %33 = arith.maximumf %4, %8 : vector<8x128xf32>
    %34 = arith.maximumf %33, %12 : vector<8x128xf32>
    %35 = arith.maximumf %34, %16 : vector<8x128xf32>
    %36 = arith.maximumf %35, %20 : vector<8x128xf32>
    %37 = arith.maximumf %36, %24 : vector<8x128xf32>
    %38 = arith.maximumf %37, %28 : vector<8x128xf32>
    %39 = arith.maximumf %38, %32 : vector<8x128xf32>
    %40 = arith.subf %4, %39 : vector<8x128xf32>
    %41 = math.exp %40 : vector<8x128xf32>
    %c0_33 = arith.constant 0 : index
    %c0_34 = arith.constant 0 : index
    %c0_35 = arith.constant 0 : index
    %c0_36 = arith.constant 0 : index
    %42 = vector.load %arg2[%c0_33, %c0_34, %c0_35, %c0_36] : memref<1x8x8x128xf32, #tpu.memory_space<vmem>>, vector<1x1x8x128xf32>
    %43 = vector.shape_cast %42 : vector<1x1x8x128xf32> to vector<8x128xf32>
    %44 = arith.mulf %41, %43 : vector<8x128xf32>
    %45 = arith.subf %8, %39 : vector<8x128xf32>
    %46 = math.exp %45 : vector<8x128xf32>
    %c0_37 = arith.constant 0 : index
    %c1_38 = arith.constant 1 : index
    %c0_39 = arith.constant 0 : index
    %c0_40 = arith.constant 0 : index
    %47 = vector.load %arg2[%c0_37, %c1_38, %c0_39, %c0_40] : memref<1x8x8x128xf32, #tpu.memory_space<vmem>>, vector<1x1x8x128xf32>
    %48 = vector.shape_cast %47 : vector<1x1x8x128xf32> to vector<8x128xf32>
    %49 = arith.addf %41, %46 : vector<8x128xf32>
    %50 = arith.mulf %46, %48 : vector<8x128xf32>
    %51 = arith.addf %44, %50 : vector<8x128xf32>
    %52 = arith.subf %12, %39 : vector<8x128xf32>
    %53 = math.exp %52 : vector<8x128xf32>
    %c0_41 = arith.constant 0 : index
    %c2_42 = arith.constant 2 : index
    %c0_43 = arith.constant 0 : index
    %c0_44 = arith.constant 0 : index
    %54 = vector.load %arg2[%c0_41, %c2_42, %c0_43, %c0_44] : memref<1x8x8x128xf32, #tpu.memory_space<vmem>>, vector<1x1x8x128xf32>
    %55 = vector.shape_cast %54 : vector<1x1x8x128xf32> to vector<8x128xf32>
    %56 = arith.addf %49, %53 : vector<8x128xf32>
    %57 = arith.mulf %53, %55 : vector<8x128xf32>
    %58 = arith.addf %51, %57 : vector<8x128xf32>
    %59 = arith.subf %16, %39 : vector<8x128xf32>
    %60 = math.exp %59 : vector<8x128xf32>
    %c0_45 = arith.constant 0 : index
    %c3_46 = arith.constant 3 : index
    %c0_47 = arith.constant 0 : index
    %c0_48 = arith.constant 0 : index
    %61 = vector.load %arg2[%c0_45, %c3_46, %c0_47, %c0_48] : memref<1x8x8x128xf32, #tpu.memory_space<vmem>>, vector<1x1x8x128xf32>
    %62 = vector.shape_cast %61 : vector<1x1x8x128xf32> to vector<8x128xf32>
    %63 = arith.addf %56, %60 : vector<8x128xf32>
    %64 = arith.mulf %60, %62 : vector<8x128xf32>
    %65 = arith.addf %58, %64 : vector<8x128xf32>
    %66 = arith.subf %20, %39 : vector<8x128xf32>
    %67 = math.exp %66 : vector<8x128xf32>
    %c0_49 = arith.constant 0 : index
    %c4_50 = arith.constant 4 : index
    %c0_51 = arith.constant 0 : index
    %c0_52 = arith.constant 0 : index
    %68 = vector.load %arg2[%c0_49, %c4_50, %c0_51, %c0_52] : memref<1x8x8x128xf32, #tpu.memory_space<vmem>>, vector<1x1x8x128xf32>
    %69 = vector.shape_cast %68 : vector<1x1x8x128xf32> to vector<8x128xf32>
    %70 = arith.addf %63, %67 : vector<8x128xf32>
    %71 = arith.mulf %67, %69 : vector<8x128xf32>
    %72 = arith.addf %65, %71 : vector<8x128xf32>
    %73 = arith.subf %24, %39 : vector<8x128xf32>
    %74 = math.exp %73 : vector<8x128xf32>
    %c0_53 = arith.constant 0 : index
    %c5_54 = arith.constant 5 : index
    %c0_55 = arith.constant 0 : index
    %c0_56 = arith.constant 0 : index
    %75 = vector.load %arg2[%c0_53, %c5_54, %c0_55, %c0_56] : memref<1x8x8x128xf32, #tpu.memory_space<vmem>>, vector<1x1x8x128xf32>
    %76 = vector.shape_cast %75 : vector<1x1x8x128xf32> to vector<8x128xf32>
    %77 = arith.addf %70, %74 : vector<8x128xf32>
    %78 = arith.mulf %74, %76 : vector<8x128xf32>
    %79 = arith.addf %72, %78 : vector<8x128xf32>
    %80 = arith.subf %28, %39 : vector<8x128xf32>
    %81 = math.exp %80 : vector<8x128xf32>
    %c0_57 = arith.constant 0 : index
    %c6_58 = arith.constant 6 : index
    %c0_59 = arith.constant 0 : index
    %c0_60 = arith.constant 0 : index
    %82 = vector.load %arg2[%c0_57, %c6_58, %c0_59, %c0_60] : memref<1x8x8x128xf32, #tpu.memory_space<vmem>>, vector<1x1x8x128xf32>
    %83 = vector.shape_cast %82 : vector<1x1x8x128xf32> to vector<8x128xf32>
    %84 = arith.addf %77, %81 : vector<8x128xf32>
    %85 = arith.mulf %81, %83 : vector<8x128xf32>
    %86 = arith.addf %79, %85 : vector<8x128xf32>
    %87 = arith.subf %32, %39 : vector<8x128xf32>
    %88 = math.exp %87 : vector<8x128xf32>
    %c0_61 = arith.constant 0 : index
    %c7_62 = arith.constant 7 : index
    %c0_63 = arith.constant 0 : index
    %c0_64 = arith.constant 0 : index
    %89 = vector.load %arg2[%c0_61, %c7_62, %c0_63, %c0_64] : memref<1x8x8x128xf32, #tpu.memory_space<vmem>>, vector<1x1x8x128xf32>
    %90 = vector.shape_cast %89 : vector<1x1x8x128xf32> to vector<8x128xf32>
    %91 = arith.addf %84, %88 : vector<8x128xf32>
    %92 = arith.mulf %88, %90 : vector<8x128xf32>
    %93 = arith.addf %86, %92 : vector<8x128xf32>
    %94 = tpu.reciprocal %91 {approx = true} : vector<8x128xf32> -> vector<8x128xf32>
    %95 = arith.mulf %91, %94 : vector<8x128xf32>
    %cst_65 = arith.constant 2.000000e+00 : f32
    %96 = vector.broadcast %cst_65 : f32 to vector<8x128xf32>
    %97 = arith.subf %96, %95 : vector<8x128xf32>
    %98 = arith.mulf %94, %97 : vector<8x128xf32>
    %99 = arith.mulf %93, %98 : vector<8x128xf32>
    %c0_66 = arith.constant 0 : index
    %c0_67 = arith.constant 0 : index
    %100 = vector.load %arg4[%c0_66, %c0_67] : memref<16x8xbf16, #tpu.memory_space<vmem>>, vector<16x8xbf16>
    %101 = arith.truncf %99 : vector<8x128xf32> to vector<8x128xbf16>
    %cst_68 = arith.constant dense<0.000000e+00> : vector<16x128xf32>
    %102 = tpu.matmul %100, %101, %cst_68 {dimension_numbers = #tpu.dot_dimension_numbers<[1], [0], [0], [1], [0, 0, 1, 1], [], []>} : vector<16x8xbf16>, vector<8x128xbf16>, vector<16x128xf32> -> vector<16x128xf32>
    %c0_69 = arith.constant 0 : index
    %c0_70 = arith.constant 0 : index
    %103 = vector.load %arg5[%c0_69, %c0_70] : memref<16x1xf32, #tpu.memory_space<vmem>>, vector<16x1xf32>
    %104 = vector.broadcast %103 : vector<16x1xf32> to vector<16x128xf32>
    %105 = arith.addf %102, %104 : vector<16x128xf32>
    %cst_71 = arith.constant 0.000000e+00 : f32
    %106 = vector.broadcast %cst_71 : f32 to vector<16x128xf32>
    %107 = arith.maximumf %105, %106 : vector<16x128xf32>
    %c0_72 = arith.constant 0 : index
    %c0_73 = arith.constant 0 : index
    %c0_74 = arith.constant 0 : index
    %108 = vector.load %arg6[%c0_72, %c0_73, %c0_74] : memref<1x16x128xf32, #tpu.memory_space<vmem>>, vector<1x16x128xf32>
    %109 = vector.shape_cast %108 : vector<1x16x128xf32> to vector<16x128xf32>
    %110 = vector.shape_cast %107 : vector<16x128xf32> to vector<1x16x128xf32>
    tpu.vector_store %arg6[%c0_72, %c0_73, %c0_74], %110 {strides = array<i32>} : memref<1x16x128xf32, #tpu.memory_space<vmem>>, vector<1x16x128xf32>,
    return
  }
  func.func @transform_0(%arg0: i32, %arg1: i32) -> (i32, i32, i32, i32) {
    %c0_i32 = arith.constant 0 : i32
    %c0_i32_0 = arith.constant 0 : i32
    %c0_i32_1 = arith.constant 0 : i32
    return %arg0, %c0_i32, %c0_i32_0, %arg1 : i32, i32, i32, i32
  }
  func.func @transform_1(%arg0: i32, %arg1: i32) -> (i32, i32) {
    %c0_i32 = arith.constant 0 : i32
    %c0_i32_0 = arith.constant 0 : i32
    %c0_i32_1 = arith.constant 0 : i32
    return %c0_i32, %c0_i32_0 : i32, i32
  }
  func.func @transform_2(%arg0: i32, %arg1: i32) -> (i32, i32) {
    %c0_i32 = arith.constant 0 : i32
    %c0_i32_0 = arith.constant 0 : i32
    %c0_i32_1 = arith.constant 0 : i32
    return %c0_i32, %c0_i32_0 : i32, i32
  }
  func.func @transform_3(%arg0: i32, %arg1: i32) -> (i32, i32) {
    %c0_i32 = arith.constant 0 : i32
    %c0_i32_0 = arith.constant 0 : i32
    %c0_i32_1 = arith.constant 0 : i32
    return %c0_i32, %c0_i32_0 : i32, i32
  }
  func.func @transform_4(%arg0: i32, %arg1: i32) -> (i32, i32, i32) {
    %c0_i32 = arith.constant 0 : i32
    %c0_i32_0 = arith.constant 0 : i32
    return %arg0, %c0_i32, %arg1 : i32, i32, i32
  }
}

</mosaic_0001>

<bundles_post_ra>
// kernel: tpu_custom_call.1
= control target key start
LH: loop header
LB: loop body
LE: loop exit
PB: predicated region body
PF: predicated region fallthrough
CT: control target
= control target key end

     0   :  { %9 = vsyncpa [#allocation3], 0  ;;  %s1056_s0 = inlined_call_operand.hbm [shape: f32[2,8,8,128], index: 0, kind: input, shape index: {}]   ;;  %s1057_s1 = inlined_call_operand.vmem [shape: bf16[8,8], index: 1, kind: input, shape index: {}]   ;;  %s1058_s2 = inlined_call_operand.vmem [shape: bf16[16,8], index: 2, kind: input, shape index: {}]   ;;  %s1059_s3 = inlined_call_operand.vmem [shape: f32[16,1], index: 3, kind: input, shape index: {}]   ;;  %s1060_s4 = inlined_call_operand.hbm [shape: f32[2,16,128], index: 4, kind: output, shape index: {}]  }
   0x1   :  { %11 = vsyncpa [#allocation3 + $0x1], 0 }
   0x2   :  { %12 = vsyncpa [#allocation4], 0 }
   0x3   :  { %14 = vsyncpa [#allocation4 + $0x1], 0  ;;  %s865_s15 = smov 0   ;;  %s867_s16 = smov 0  }
   0x4   :  { %s869_s17 = smov 0   ;;  %s871_s18 = smov 0  }
   0x5   :  { %s873_s19 = smov 0   ;;  %s875_s20 = smov 0  }
   0x6 LB: > { %s597_s21 = sadd.s32 4294967295, %s833_s20   ;;  %s598_s22 = sadd.s32 4294967294, %s833_s20   ;;  %s833_s20 = sphi %s875_s20, %s20_s20   ;;  %s829_s19 = sphi %s873_s19, %s1069_s19   ;;  %s825_s18 = sphi %s871_s18, %s1068_s18   ;;  %s821_s17 = sphi %s869_s17, %s1067_s17   ;;  %s817_s16 = sphi %s867_s16, %s1066_s16   ;;  %s813_s15 = sphi %s865_s15, %s1065_s15  }
   0x7   : > { %s32_s23 = sadd.s32 1, %s829_s19  ;;  %s41_s24 = sadd.s32 1, %s821_s17 }
   0x8   : > { %p34_p0 = scmp.ge.s32.totalorder %s32_s23, 2  ;;  %p48_p1 = scmp.ne.s32.totalorder %s821_s17, %s817_s16 }
   0x9   : > { %p49_p2 = scmp.eq.s32.totalorder %s833_s20, 0  ;;  %p54_p3 = scmp.ne.s32.totalorder %s817_s16, %s813_s15 }
   0xa   : > { %s1071_s23 = smov (%p34_p0, %s32_s23), 0  ;;  %p55_p5 = scmp.eq.s32.totalorder %s597_s21, 0 }
   0xb   : > { %p906_p4 = por %p49_p2, %p48_p1  ;;  %s36_s26 = ssub.s32 %s829_s19, %s1071_s23 }
   0xc   : > { %p143_p6 = scmp.eq.s32.totalorder %s597_s21, 1  ;;  %p39_p7 = scmp.eq.s32.totalorder %s36_s26, 0 }
   0xd   : > { %p912_p8 = por %p55_p5, %p54_p3  ;;  %p149_p10 = scmp.eq.s32.totalorder %s598_s22, 1 }
   0xe   : > { %p916_p9 = por %p143_p6, %p48_p1  ;;  %p600_p12 = scmp.ge.s32.totalorder %s833_s20, 2 }
   0xf   : > { %s921_s29 = scalar_select %p39_p7, %s821_s17, %s41_s24  }
  0x10   : > { %p923_p11 = por %p149_p10, %p54_p3  ;;  %p647_p13 = scmp.lt.s32.totalorder %s833_s20, 2 }
  0x11   : > { %s178_s5 = sand.u32 1, %s821_s17   ;;  %s632_s7 = sshll.u32 %s829_s19, 6 }
  0x12   : > { %s601_s6 = sshll.u32 %s178_s5, 6  ;;  %s188_s10 = scalar_lea.hbm %s1056_s0, %s632_s7 }
  0x13   : > { %s182_s11 = scalar_lea.vmem [#allocation2], %s601_s6  ;;  %s189_s13 = sshll.u32 %s188_s10, 4  ;;  %s190_s13 = int_to_ptr.hbm [resolvable:$true] %s189_s13 }
  0x14   : > { %s191_s12 = sshll.u32 %s182_s11, 4  ;;  %p640_p0 = pnand %p647_p13, %p906_p4  ;;  %s192_s12 = int_to_ptr.vmem [resolvable:$true] %s191_s12 }
  0x15   : > { %p604_p1 = scmp.ge.s32.totalorder %s833_s20, 1  ;;  %s179_s14 = scalar_lea.sflag [#allocation3], %s178_s5 }
  0x16   : > { %s835_s21 = smov 128   ;;  %s836_s22 = smov 8  }
  0x17   : > { %642 = dma.hbm_to_vmem [thread:$0]  (!%p640_p0), %s190_s13, 1024, %s192_s12, %s179_s14, %s835_s21, %s835_s21, %s836_s22  }
  0x18   : > { %p199_p2 = scmp.lt.s32.totalorder %s833_s20, 3 }
  0x1a   : > { %p200_p3 = pnand %p604_p1, %p199_p2 }
  0x1b   : > { %s939_s24 = sand.u32 (!%p200_p3), 1, %s817_s16  }
  0x1c   : > { %203 = sbr.rel (%p200_p3) target bundleno = 384 (0x180), region = 36  ;;  %s605_s26 = sshll.u32 (!%p200_p3), %s939_s24, 6 }
  0x1d   : > { %s206_s6 = scalar_lea.sflag (!%p200_p3), [#allocation3], %s939_s24  ;;  %s209_s7 = scalar_lea.vmem (!%p200_p3), [#allocation2], %s605_s26 }
  0x21   : > { %804 = dma.done.wait (%p912_p8), %s206_s6, 1024  }
  0x22   : > { %806 = vsyncadd (%p912_p8), %s206_s6, 4294966272  ;;  %v947_v0 = vld [vmem:[%s209_s7] sm:$0xff]  ;;  %vm243_vm0 = vcmask 1043456   ;;  %v949_v1 = vld [vmem:[%s209_s7 + $0x8] sm:$0xff]  ;;  %vm239_vm1 = vcmask 64512   ;;  %s606_s13 = sshll.u32 %s939_s24, 4 }
  0x23   : > { %v951_v2 = vld [vmem:[%s209_s7 + $0x10] sm:$0xff]  ;;  %v238_v3 = vpack.c.bf16 %v947_v0, %v947_v0  ;;  %v262_v4 = vpack.c.bf16 %v949_v1, %v949_v1  ;;  %v959_v6 = vld [vmem:[%s209_s7 + $0x18] sm:$0xff]  ;;  %v961_v7 = vld [vmem:[%s209_s7 + $0x20] sm:$0xff]  ;;  %s634_s14 = sshll.u32 %s825_s18, 4  ;;  %s234_s21 = scalar_lea.vmem [#allocation5], %s606_s13 }
  0x24   : > { %v281_v5 = vpack.c.bf16 %v951_v2, %v951_v2  ;;  %v300_v8 = vpack.c.bf16 %v959_v6, %v959_v6  ;;  %v319_v9 = vpack.c.bf16 %v961_v7, %v961_v7  ;;  %v967_v10 = vld [vmem:[%s209_s7 + $0x28] sm:$0xff]  ;;  %v969_v11 = vld [vmem:[%s209_s7 + $0x30] sm:$0xff]  ;;  %v971_v12 = vld [vmem:[%s209_s7 + $0x38] sm:$0xff]  ;;  %s508_s6 = scalar_lea.hbm %s1060_s4, %s634_s14  ;;  %s509_s7 = sshll.u32 %s234_s21, 4  ;;  %s510_s7 = int_to_ptr.vmem [resolvable:$true] %s509_s7 }
  0x25   : > { %v245_v13 = vsel %vm243_vm0, %v238_v3, 0  ;;  %v264_v14 = vsel %vm243_vm0, %v262_v4, 0  ;;  %v338_v16 = vpack.c.bf16 %v967_v10, %v967_v10  ;;  %v236_v18 = vld [vmem:[%s1057_s1] sm:$0xf]  ;;  %v357_v20 = vpack.c.bf16 %v969_v11, %v969_v11  ;;  %s511_s25 = sshll.u32 %s508_s6, 4  ;;  %s496_s27 = scalar_lea.sflag [#allocation4], %s939_s24  ;;  %s512_s25 = int_to_ptr.hbm [resolvable:$true] %s511_s25 }
  0x26   : > { %v283_v15 = vsel %vm243_vm0, %v281_v5, 0  ;;  %254 = vmatpush.bf16.msra.mxu0 %v245_v13  ;;  %273 = vmatpush.bf16.msra.mxu1 %v264_v14  ;;  %v302_v17 = vsel %vm243_vm0, %v300_v8, 0  ;;  %v321_v19 = vsel %vm243_vm0, %v319_v9, 0  ;;  %v376_v21 = vpack.c.bf16 %v971_v12, %v971_v12  ;;  %s765_s5 = sshra.s32 %s512_s25, 4  ;;  %s771_s10 = scalar_lea.hbm %s1060_s4, 32  ;;  %s766_s5 = int_to_ptr.hbm [resolvable:$true] %s765_s5 }
  0x27   : > { %292 = vmatpush.bf16.msra.mxu2 %v283_v15  ;;  %311 = vmatpush.bf16.msra.mxu3 %v302_v17  ;;  %v340_v22 = vsel %vm243_vm0, %v338_v16, 0  ;;  %v359_v23 = vsel %vm243_vm0, %v357_v20, 0  ;;  %v837_v20 = vmov 0   ;;  %s767_s18 = scalar_lea.hbm %s766_s5, 16  ;;  %p772_p7 = scmp.lt.s32.totalorder %s766_s5, %s1060_s4 }
  0x28   : > { %v378_v24 = vsel %vm243_vm0, %v376_v21, 0  ;;  %702 = vset.pattern.permute.xlu0 %v837_v20  ;;  %p768_p4 = scmp.ne.s32.totalorder %s766_s5, %s767_s18  ;;  %p773_p8 = scmp.lt.s32.totalorder %s771_s10, %s767_s18 }
  0x29   : > { %607 = vmatmul.msk.bf16.vlgmr.msra.gmra.mxu0 %vm239_vm1, %v236_v18  ;;  %609 = vmatmul.msk.bf16.vlgmr.msra.gmra.mxu1 %vm239_vm1, %v236_v18 }
  0x2a   : > { %330 = vmatpush.bf16.msrb.mxu0 %v321_v19  ;;  %349 = vmatpush.bf16.msrb.mxu1 %v340_v22  ;;  %p769_p5 = pnand %p768_p4, %p916_p9  ;;  %p774_p10 = por %p773_p8, %p772_p7 }
  0x2b   : > { %611 = vmatmul.msk.bf16.vlgmr.msra.gmra.mxu2 %vm239_vm1, %v236_v18  ;;  %613 = vmatmul.msk.bf16.vlgmr.msra.gmra.mxu3 %vm239_vm1, %v236_v18 }
  0x2c   : > { %368 = vmatpush.bf16.msrb.mxu2 %v359_v23  ;;  %387 = vmatpush.bf16.msrb.mxu3 %v378_v24  ;;  %p770_p6 = pneg %p769_p5 }
  0x2e   : > { %p775_p13 = pnand %p774_p10, %p770_p6 }
  0x39   : > { %615 = vmatmul.msk.bf16.vlgmr.msrb.gmra.mxu0 %vm239_vm1, %v236_v18  ;;  %617 = vmatmul.msk.bf16.vlgmr.msrb.gmra.mxu1 %vm239_vm1, %v236_v18 }
  0x3b   : > { %619 = vmatmul.msk.bf16.vlgmr.msrb.gmra.mxu2 %vm239_vm1, %v236_v18  ;;  %621 = vmatmul.msk.bf16.vlgmr.msrb.gmra.mxu3 %vm239_vm1, %v236_v18  ;;  %v454_v18 = vld [vmem:[%s1059_s3] sm:$0xff] }
  0x3c   : > { %458 = vperm.xlu0 %702, %v454_v18  }
  0xa6   : > { %v256_v25 = vpop.f32.mrf.mxu0  ;;  %v275_v26 = vpop.f32.mrf.mxu1 }
  0xa7   : > { %v393_v31 = vmax.f32 %v256_v25, %v275_v26 }
  0xae   : > { %v294_v27 = vpop.f32.mrf.mxu2  ;;  %v313_v28 = vpop.f32.mrf.mxu3 }
  0xaf   : > { %v258_v29 = vpop.f32.mrf.mxu0  ;;  %v277_v30 = vpop.f32.mrf.mxu1  ;;  %v394_v32 = vmax.f32 %v393_v31, %v294_v27 }
  0xb1   : > { %v395_v35 = vmax.f32 %v394_v32, %v313_v28 }
  0xb6   : > { %v296_v33 = vpop.f32.mrf.mxu2  ;;  %v315_v34 = vpop.f32.mrf.mxu3 }
  0xb7   : > { %v332_v36 = vpop.f32.mrf.mxu0  ;;  %v351_v37 = vpop.f32.mrf.mxu1 }
  0xb8   : > { %v396_v38 = vmax.f32 %v395_v35, %v332_v36 }
  0xba   : > { %v397_v39 = vmax.f32 %v396_v38, %v351_v37 }
  0xbe   : > { %v370_v40 = vpop.f32.mrf.mxu2  ;;  %v389_v41 = vpop.f32.mrf.mxu3 }
  0xbf   : > { %v398_v42 = vmax.f32 %v397_v39, %v370_v40  ;;  %v334_v43 = vpop.f32.mrf.mxu0  ;;  %v353_v44 = vpop.f32.mrf.mxu1 }
  0xc1   : > { %v399_v45 = vmax.f32 %v398_v42, %v389_v41 }
  0xc3   : > { %v400_v46 = vsub.f32 %v256_v25, %v399_v45  ;;  %v404_v47 = vsub.f32 %v275_v26, %v399_v45  ;;  %v410_v48 = vsub.f32 %v294_v27, %v399_v45  ;;  %v416_v49 = vsub.f32 %v313_v28, %v399_v45 }
  0xc4   : > { %v422_v53 = vsub.f32 %v332_v36, %v399_v45  ;;  %v428_v57 = vsub.f32 %v351_v37, %v399_v45  ;;  %v434_v59 = vsub.f32 %v370_v40, %v399_v45  ;;  %v440_v61 = vsub.f32 %v389_v41, %v399_v45 }
  0xc5   : > { %v401_v50 = vmul.f32 1.442695, %v400_v46  ;;  %v405_v51 = vmul.f32 1.442695, %v404_v47  ;;  %v411_v52 = vmul.f32 1.442695, %v410_v48 }
  0xc6   : > { %v372_v54 = vpop.f32.mrf.mxu2  ;;  %v391_v55 = vpop.f32.mrf.mxu3  ;;  %v417_v56 = vmul.f32 1.442695, %v416_v49  ;;  %v423_v58 = vmul.f32 1.442695, %v422_v53  ;;  %v429_v60 = vmul.f32 1.442695, %v428_v57 }
  0xc7   : > { %703 = vpow2.f32 %v401_v50  ;;  %v435_v3 = vmul.f32 1.442695, %v434_v59  ;;  %v441_v13 = vmul.f32 1.442695, %v440_v61 }
  0xc8   : > { %705 = vpow2.f32 %v405_v51 }
  0xc9   : > { %707 = vpow2.f32 %v411_v52 }
  0xca   : > { %709 = vpow2.f32 %v417_v56 }
  0xcb   : > { %711 = vpow2.f32 %v423_v58 }
  0xcc   : > { %713 = vpow2.f32 %v429_v60 }
  0xcd   : > { %v704_v62 = vpop.eup %703  ;;  %715 = vpow2.f32 %v435_v3 }
  0xce   : > { %v706_v63 = vpop.eup %705  ;;  %v403_v4 = vmul.f32 %v704_v62, %v947_v0  ;;  %717 = vpow2.f32 %v441_v13 }
  0xcf   : > { %v708_v5 = vpop.eup %707  ;;  %v407_v8 = vadd.f32 %v706_v63, %v704_v62  ;;  %v408_v9 = vmul.f32 %v706_v63, %v949_v1 }
  0xd0   : > { %v710_v16 = vpop.eup %709  ;;  %v414_v17 = vmul.f32 %v708_v5, %v951_v2  ;;  %v455_v2 = vld [vmem:[%s1059_s3 + $0x8] sm:$0xff] }
  0xd1   : > { %v413_v14 = vadd.f32 %v708_v5, %v407_v8  ;;  %v409_v15 = vadd.f32 %v408_v9, %v403_v4  ;;  %v712_v0 = vpop.eup %711  ;;  %v420_v23 = vmul.f32 %v710_v16, %v959_v6  ;;  %463 = vperm.xlu0 %702, %v455_v2  }
  0xd2   : > { %v714_v22 = vpop.eup %713  ;;  %v426_v29 = vmul.f32 %v712_v0, %v961_v7 }
  0xd3   : > { %v419_v19 = vadd.f32 %v710_v16, %v413_v14  ;;  %v415_v21 = vadd.f32 %v414_v17, %v409_v15  ;;  %v716_v25 = vpop.eup %715  ;;  %v432_v32 = vmul.f32 %v714_v22, %v967_v10  ;;  %v633_v10 = vld [vmem:[%s1058_s2] sm:$0xff] }
  0xd4   : > { %v718_v28 = vpop.eup %717  ;;  %v438_v6 = vmul.f32 %v716_v25, %v969_v11  ;;  %v459_v11 = vpop.permute.xlu0 %458 }
  0xd5   : > { %v425_v1 = vadd.f32 %v712_v0, %v419_v19  ;;  %v421_v26 = vadd.f32 %v420_v23, %v415_v21  ;;  %v444_v37 = vmul.f32 %v718_v28, %v971_v12 }
  0xd7   : > { %v431_v24 = vadd.f32 %v714_v22, %v425_v1  ;;  %v427_v31 = vadd.f32 %v426_v29, %v421_v26 }
  0xd9   : > { %v437_v27 = vadd.f32 %v716_v25, %v431_v24  ;;  %v433_v33 = vadd.f32 %v432_v32, %v427_v31 }
  0xdb   : > { %v443_v30 = vadd.f32 %v718_v28, %v437_v27  ;;  %v439_v35 = vadd.f32 %v438_v6, %v433_v33 }
  0xdd   : > { %719 = vrcp.f32 %v443_v30  ;;  %v445_v39 = vadd.f32 %v444_v37, %v439_v35 }
  0xe3   : > { %v720_v34 = vpop.eup %719 }
  0xe4   : > { %v447_v36 = vmul.f32 %v720_v34, %v443_v30 }
  0xe6   : > { %v448_v38 = vsub.f32 2.0, %v447_v36 }
  0xe8   : > { %v449_v40 = vmul.f32 %v720_v34, %v448_v38 }
  0xea   : > { %v450_v7 = vmul.f32 %v449_v40, %v445_v39 }
  0xec   : > { %v453_v41 = vpack.c.bf16 %v450_v7, %v450_v7 }
  0xee   : > { %v475_v42 = vsel %vm243_vm0, %v453_v41, 0 }
  0xef   : > { %484 = vmatpush.bf16.msra.mxu0 %v475_v42 }
  0xf2   : > { %626 = vmatmul.msk.bf16.vlgmr.msra.gmra.mxu0 %vm239_vm1, %v633_v10 }
 0x143   : > { %v464_v45 = vpop.permute.xlu0 %463 }
 0x16f   : > { %v486_v43 = vpop.f32.mrf.mxu0 }
 0x170   : > { %v487_v44 = vadd.f32 %v486_v43, %v459_v11 }
 0x172   : > { %v491_v12 = vmax.f32 %v487_v44, 0.0 }
 0x174   : > { %493 = vst [vmem:[%s234_s21] sm:$0xff] %v491_v12 }
 0x177   : > { %v488_v46 = vpop.f32.mrf.mxu0 }
 0x178   : > { %v489_v47 = vadd.f32 %v488_v46, %v464_v45 }
 0x17a   : > { %v492_v48 = vmax.f32 %v489_v47, 0.0 }
 0x17c   : > { %494 = vst [vmem:[%s234_s21 + $0x8] sm:$0xff] %v492_v48 }
 0x17d   : > { %778 = shalt.err (!%p775_p13)
}
 0x17e   : > { %s838_s24 = smov 128   ;;  %s839_s13 = smov 8  }
 0x17f   : > { %637 = dma.vmem_to_hbm [thread:$0]  (%p916_p9), %s510_s7, 256, %s512_s25, %s496_s27, %s838_s24, %s838_s24, %s839_s13  }
 0x180 PF: > { %s526_s14 = sand.u32 1, %s813_s15   ;;  %p644_p0 = pnand %p600_p12, %p923_p11 }
 0x181   : > { %s527_s21 = scalar_lea.sflag [#allocation4], %s526_s14 }
 0x182   : > { %p645_p1 = pneg %p644_p0 }
 0x184   : > { %808 = dma.done.wait (%p645_p1), %s527_s21, 256  }
 0x185   : > { %810 = vsyncadd (%p645_p1), %s527_s21, 4294967040  ;;  %s20_s20 = sadd.s32 1, %s833_s20   ;;  %s1065_s15 = smov %s817_s16 }
 0x186   : > { %p17_p2 = scmp.ge.s32.totalorder %s20_s20, 4   ;;  %s1066_s16 = smov %s821_s17 }
 0x187   : > { %s1067_s17 = smov %s921_s29  ;;  %s1068_s18 = smov %s829_s19 }
 0x188   : > { %s1069_s19 = smov %s1071_s23  ;;  %19 = sbr.rel (!%p17_p2) target bundleno = 6 (0x6), region = 88 }
 0x18d   :  { %533 = vsyncpa [#allocation3], 1 }
 0x18e   :  { %535 = vsyncpa [#allocation3 + $0x1], 1 }
 0x18f   :  { %536 = vsyncpa [#allocation4], 1 }
 0x190   :  { %538 = vsyncpa [#allocation4 + $0x1], 1 }

</bundles_post_ra>
